<compile_context>
chip_gen: v6e
topology: v6e:2x2x1
jax: 0.10.0
libtpu: 0.0.40
codegen_flags: <defaults>
</compile_context>

<pallas_src>
import jax
import jax.numpy as jnp
from jax.experimental import pallas as pl
from jax.experimental.pallas import tpu as pltpu


def _round_up(x: int, mult: int) -> int:
    return ((x + mult - 1) // mult) * mult


def _average_ac_kernel(adj_ref, feat_ref, out_ref, acc_ref, deg_ref):
    # adj_ref:  (TM, TK)   tile of adjacency rows / neighbor columns
    # feat_ref: (TK, Dp)   matching feature slab
    # out_ref:  (TM, Dp)   output row tile (written once, on last K step)
    # acc_ref:  (TM, Dp)   f32 matmul accumulator (VMEM scratch)
    # deg_ref:  (TM, 1)    f32 row-degree accumulator (VMEM scratch)
    k = pl.program_id(1)

    @pl.when(k == 0)
    def _():
        acc_ref[...] = jnp.zeros_like(acc_ref)
        deg_ref[...] = jnp.zeros_like(deg_ref)

    adj = adj_ref[...]
    # Accumulate the (un-normalized) aggregation and the row degree.
    deg_ref[...] += jnp.sum(adj.astype(jnp.float32), axis=1, keepdims=True)
    acc_ref[...] += jnp.dot(adj, feat_ref[...], preferred_element_type=jnp.float32)

    @pl.when(k == pl.num_programs(1) - 1)
    def _():
        degree = jnp.maximum(deg_ref[...], 1.0)
        # Normalize the small accumulator instead of the big adjacency tile.
        out_ref[...] = (acc_ref[...] * pl.reciprocal(degree, approx=False)).astype(
            out_ref.dtype
        )


def average_ac(
    adj: jax.Array,
    feature_src: jax.Array,
    *,
    row_tile: int = 256,
    k_tile: int = 512,
) -> jax.Array:
    """Row-normalized adjacency aggregation: (adj / clamp(rowsum, 1)) @ feature_src."""
    n, m = adj.shape
    m2, d = feature_src.shape
    assert m == m2, "adj columns must match feature rows"

    # Effective tile sizes (never larger than the padded problem itself).
    tm = min(row_tile, _round_up(n, 8))
    tk = min(k_tile, _round_up(m, 128))
    n_pad = _round_up(n, tm)
    m_pad = _round_up(m, tk)
    d_pad = _round_up(d, 128)  # lane-dense output stores

    adj_p = adj
    if (n_pad, m_pad) != (n, m):
        adj_p = jnp.pad(adj, ((0, n_pad - n), (0, m_pad - m)))
    feat_p = feature_src
    if (m_pad, d_pad) != (m, d):
        feat_p = jnp.pad(feature_src, ((0, m_pad - m), (0, d_pad - d)))

    grid = (n_pad // tm, m_pad // tk)  # (row tiles [parallel], K reduction [arbitrary])

    out = pl.pallas_call(
        _average_ac_kernel,
        out_shape=jax.ShapeDtypeStruct((n_pad, d_pad), feature_src.dtype),
        grid_spec=pltpu.PrefetchScalarGridSpec(
            num_scalar_prefetch=0,
            grid=grid,
            in_specs=[
                pl.BlockSpec((tm, tk), lambda i, k: (i, k)),      # adj tile
                pl.BlockSpec((tk, d_pad), lambda i, k: (k, 0)),   # feature K-slab
            ],
            out_specs=pl.BlockSpec((tm, d_pad), lambda i, k: (i, 0)),
            scratch_shapes=[
                pltpu.VMEM((tm, d_pad), jnp.float32),  # matmul accumulator
                pltpu.VMEM((tm, 1), jnp.float32),      # degree accumulator
            ],
        ),
        compiler_params=pltpu.CompilerParams(
            dimension_semantics=("parallel", "arbitrary"),
            vmem_limit_bytes=48 * 1024 * 1024,
        ),
    )(adj_p, feat_p)

    return out[:n, :d]


def _reference(adj, feature_src):
    deg = jnp.maximum(jnp.sum(adj, axis=1, keepdims=True), 1.0)
    return (adj / deg) @ feature_src


if __name__ == "__main__":
    key = jax.random.PRNGKey(0)
    k_adj, k_feat, k_adj2, k_feat2 = jax.random.split(key, 4)

    # Small synthetic graph: N=16 nodes, M=32 neighbors, D=64 feature dim.
    N, M, D = 16, 32, 64
    adj = (jax.random.uniform(k_adj, (N, M)) > 0.8).astype(jnp.float32)
    adj = adj.at[0].set(0.0)  # isolated node -> exercises the max(1, .) clamp
    feature_src = jax.random.normal(k_feat, (M, D), dtype=jnp.float32)

    out = jax.block_until_ready(average_ac(adj, feature_src))
    ref = _reference(adj, feature_src)
    assert out.shape == (N, D)
    assert jnp.allclose(out, ref, atol=1e-5, rtol=1e-5), "mismatch vs reference (case 1)"

    # Second small case with awkward (non-multiple) shapes so padding and the
    # multi-step K reduction path are exercised.
    N2, M2, D2 = 40, 300, 96
    adj2 = (jax.random.uniform(k_adj2, (N2, M2)) > 0.9).astype(jnp.float32)
    adj2 = adj2.at[3].set(0.0)
    feature_src2 = jax.random.normal(k_feat2, (M2, D2), dtype=jnp.float32)

    out2 = jax.block_until_ready(average_ac(adj2, feature_src2, row_tile=32, k_tile=128))
    ref2 = _reference(adj2, feature_src2)
    assert out2.shape == (N2, D2)
    assert jnp.allclose(out2, ref2, atol=1e-5, rtol=1e-5), "mismatch vs reference (case 2)"

    print("KERNEL_OK")
</pallas_src>

<mosaic_0001>
module attributes {stable_mosaic.version = 11 : i64} {
  func.func @_average_ac_kernel(%arg0: i32, %arg1: i32, %arg2: memref<16x128xf32, #tpu.memory_space<vmem>>, %arg3: memref<128x128xf32, #tpu.memory_space<vmem>>, %arg4: memref<16x128xf32, #tpu.memory_space<vmem>>, %arg5: memref<16x128xf32, #tpu.memory_space<vmem>>, %arg6: memref<16x1xf32, #tpu.memory_space<vmem>>) attributes {dimension_semantics = [#tpu.dimension_semantics<parallel>, #tpu.dimension_semantics<arbitrary>], iteration_bounds = array<i64: 1, 1>, scalar_prefetch = 0 : i64, scratch_operands = 2 : i64, tpu.core_type = #tpu.core_type<tc>, window_params = [{transform_indices = @transform_0, window_bounds = array<i64: 16, 128>}, {transform_indices = @transform_1, window_bounds = array<i64: 128, 128>}, {transform_indices = @transform_2, window_bounds = array<i64: 16, 128>}]} {
    %c0_i32 = arith.constant 0 : i32
    %0 = arith.cmpi eq, %arg1, %c0_i32 : i32
    %1 = arith.extui %0 : i1 to i32
    %c0_i32_0 = arith.constant 0 : i32
    %2 = arith.cmpi ne, %1, %c0_i32_0 : i32
    scf.if %2 {
      %cst_15 = arith.constant 0.000000e+00 : f32
      %17 = vector.broadcast %cst_15 : f32 to vector<16x128xf32>
      %c0_16 = arith.constant 0 : index
      %c0_17 = arith.constant 0 : index
      %18 = vector.load %arg5[%c0_16, %c0_17] : memref<16x128xf32, #tpu.memory_space<vmem>>, vector<16x128xf32>
      tpu.vector_store %arg5[%c0_16, %c0_17], %17 {strides = array<i32>} : memref<16x128xf32, #tpu.memory_space<vmem>>, vector<16x128xf32>,
      %cst_18 = arith.constant 0.000000e+00 : f32
      %19 = vector.broadcast %cst_18 : f32 to vector<16x1xf32>
      %c0_19 = arith.constant 0 : index
      %c0_20 = arith.constant 0 : index
      %20 = vector.load %arg6[%c0_19, %c0_20] : memref<16x1xf32, #tpu.memory_space<vmem>>, vector<16x1xf32>
      tpu.vector_store %arg6[%c0_19, %c0_20], %19 {strides = array<i32>} : memref<16x1xf32, #tpu.memory_space<vmem>>, vector<16x1xf32>,
    } else {
    }
    %c0 = arith.constant 0 : index
    %c0_1 = arith.constant 0 : index
    %3 = vector.load %arg2[%c0, %c0_1] : memref<16x128xf32, #tpu.memory_space<vmem>>, vector<16x128xf32>
    %c0_2 = arith.constant 0 : index
    %c0_3 = arith.constant 0 : index
    %4 = vector.load %arg6[%c0_2, %c0_3] : memref<16x1xf32, #tpu.memory_space<vmem>>, vector<16x1xf32>
    %cst = arith.constant dense<0.000000e+00> : vector<16xf32>
    %5 = vector.multi_reduction <add>, %3, %cst [1] : vector<16x128xf32> to vector<16xf32>
    %6 = vector.shape_cast %5 : vector<16xf32> to vector<16x1xf32>
    %7 = arith.addf %4, %6 : vector<16x1xf32>
    %c0_4 = arith.constant 0 : index
    %c0_5 = arith.constant 0 : index
    %8 = vector.load %arg6[%c0_4, %c0_5] : memref<16x1xf32, #tpu.memory_space<vmem>>, vector<16x1xf32>
    tpu.vector_store %arg6[%c0_4, %c0_5], %7 {strides = array<i32>} : memref<16x1xf32, #tpu.memory_space<vmem>>, vector<16x1xf32>,
    %c0_6 = arith.constant 0 : index
    %c0_7 = arith.constant 0 : index
    %9 = vector.load %arg5[%c0_6, %c0_7] : memref<16x128xf32, #tpu.memory_space<vmem>>, vector<16x128xf32>
    %c0_8 = arith.constant 0 : index
    %c0_9 = arith.constant 0 : index
    %10 = vector.load %arg3[%c0_8, %c0_9] : memref<128x128xf32, #tpu.memory_space<vmem>>, vector<128x128xf32>
    %cst_10 = arith.constant dense<0.000000e+00> : vector<16x128xf32>
    %11 = tpu.matmul %3, %10, %cst_10 {dimension_numbers = #tpu.dot_dimension_numbers<[1], [0], [0], [1], [0, 0, 1, 1], [], []>} : vector<16x128xf32>, vector<128x128xf32>, vector<16x128xf32> -> vector<16x128xf32>
    %12 = arith.addf %9, %11 : vector<16x128xf32>
    %c0_11 = arith.constant 0 : index
    %c0_12 = arith.constant 0 : index
    %13 = vector.load %arg5[%c0_11, %c0_12] : memref<16x128xf32, #tpu.memory_space<vmem>>, vector<16x128xf32>
    tpu.vector_store %arg5[%c0_11, %c0_12], %12 {strides = array<i32>} : memref<16x128xf32, #tpu.memory_space<vmem>>, vector<16x128xf32>,
    %c0_i32_13 = arith.constant 0 : i32
    %14 = arith.cmpi eq, %arg1, %c0_i32_13 : i32
    %15 = arith.extui %14 : i1 to i32
    %c0_i32_14 = arith.constant 0 : i32
    %16 = arith.cmpi ne, %15, %c0_i32_14 : i32
    scf.if %16 {
      %c0_15 = arith.constant 0 : index
      %c0_16 = arith.constant 0 : index
      %17 = vector.load %arg6[%c0_15, %c0_16] : memref<16x1xf32, #tpu.memory_space<vmem>>, vector<16x1xf32>
      %cst_17 = arith.constant 1.000000e+00 : f32
      %18 = vector.broadcast %cst_17 : f32 to vector<16x1xf32>
      %19 = arith.maximumf %17, %18 : vector<16x1xf32>
      %c0_18 = arith.constant 0 : index
      %c0_19 = arith.constant 0 : index
      %20 = vector.load %arg5[%c0_18, %c0_19] : memref<16x128xf32, #tpu.memory_space<vmem>>, vector<16x128xf32>
      %21 = tpu.reciprocal %19 : vector<16x1xf32> -> vector<16x1xf32>
      %22 = vector.broadcast %21 : vector<16x1xf32> to vector<16x128xf32>
      %23 = arith.mulf %20, %22 : vector<16x128xf32>
      %c0_20 = arith.constant 0 : index
      %c0_21 = arith.constant 0 : index
      %24 = vector.load %arg4[%c0_20, %c0_21] : memref<16x128xf32, #tpu.memory_space<vmem>>, vector<16x128xf32>
      tpu.vector_store %arg4[%c0_20, %c0_21], %23 {strides = array<i32>} : memref<16x128xf32, #tpu.memory_space<vmem>>, vector<16x128xf32>,
    } else {
    }
    return
  }
  func.func @transform_0(%arg0: i32, %arg1: i32) -> (i32, i32) {
    %c0_i32 = arith.constant 0 : i32
    return %arg0, %arg1 : i32, i32
  }
  func.func @transform_1(%arg0: i32, %arg1: i32) -> (i32, i32) {
    %c0_i32 = arith.constant 0 : i32
    %c0_i32_0 = arith.constant 0 : i32
    return %arg1, %c0_i32 : i32, i32
  }
  func.func @transform_2(%arg0: i32, %arg1: i32) -> (i32, i32) {
    %c0_i32 = arith.constant 0 : i32
    %c0_i32_0 = arith.constant 0 : i32
    return %arg0, %c0_i32 : i32, i32
  }
}

</mosaic_0001>

<bundles_post_ra>
// kernel: tpu_custom_call.1
= control target key start
LH: loop header
LB: loop body
LE: loop exit
PB: predicated region body
PF: predicated region fallthrough
CT: control target
= control target key end

     0   :  { %7 = vsyncpa [#allocation5], 0  ;;  %s378_s0 = inlined_call_operand.hbm [shape: f32[16,128], index: 0, kind: input, shape index: {}]   ;;  %s379_s1 = inlined_call_operand.hbm [shape: f32[128,128], index: 1, kind: input, shape index: {}]   ;;  %s380_s2 = inlined_call_operand.hbm [shape: f32[16,128], index: 2, kind: output, shape index: {}]  }
   0x1   :  { %8 = vsyncpa [#allocation8], 0 }
   0x2   :  { %9 = vsyncpa [#allocation6], 0  ;;  %s334_s9 = smov [#allocation4]  }
   0x3   :  { %s15_s10 = sshll.u32 %s334_s9, 4  ;;  %s16_s10 = int_to_ptr.vmem [resolvable:$true] %s15_s10 }
   0x4   :  { %s276_s11 = scalar_lea.vmem %s16_s10, 256  ;;  %p281_p1 = scmp.lt.s32.totalorder %s16_s10, %s16_s10 }
   0x5   :  { %p277_p0 = scmp.ne.s32.totalorder %s16_s10, %s276_s11  ;;  %p282_p2 = scmp.lt.s32.totalorder %s276_s11, %s276_s11 }
   0x7   :  { %p283_p3 = por %p282_p2, %p281_p1 }
   0x9   :  { %p284_p4 = pnand %p283_p3, %p277_p0 }
   0xb   :  { %287 = shalt.err (!%p284_p4)
}
   0xc   :  { %s335_s12 = smov 128   ;;  %s336_s13 = smov 8  }
   0xd   :  { %21 = dma.hbm_to_vmem [thread:$0]  %s378_s0, 256, %s16_s10, [#allocation5], %s335_s12, %s335_s12, %s336_s13  }
   0xe   :  { %s337_s16 = smov [#allocation7]  }
   0xf   :  { %s27_s17 = sshll.u32 %s337_s16, 4  ;;  %s28_s17 = int_to_ptr.vmem [resolvable:$true] %s27_s17 }
  0x10   :  { %s296_s18 = scalar_lea.vmem %s28_s17, 2048  ;;  %p301_p6 = scmp.lt.s32.totalorder %s28_s17, %s28_s17 }
  0x11   :  { %p297_p5 = scmp.ne.s32.totalorder %s28_s17, %s296_s18  ;;  %p302_p7 = scmp.lt.s32.totalorder %s296_s18, %s296_s18 }
  0x13   :  { %p303_p8 = por %p302_p7, %p301_p6 }
  0x15   :  { %p304_p9 = pnand %p303_p8, %p297_p5 }
  0x17   :  { %307 = shalt.err (!%p304_p9)
}
  0x18   :  { %33 = dma.hbm_to_vmem [thread:$0]  %s379_s1, 2048, %s28_s17, [#allocation8], %s335_s12, %s335_s12, %s336_s13  }
  0x19   :  { %328 = dma.done.wait [#allocation5], 256  }
  0x1a   :  { %329 = vsyncadd [#allocation5], 4294967040 }
  0x1b   :  { %330 = dma.done.wait [#allocation8], 2048  }
  0x1c   :  { %331 = vsyncadd [#allocation8], 4294965248  ;;  %vm46_vm0 = vcmask 7168   ;;  %v338_v0 = vmov 0.0   ;;  %v49_v1 = vld [vmem:[#allocation4] sm:$0xff]  ;;  %v79_v2 = vld [vmem:[#allocation7 + $0x78] sm:$0xff] }
  0x1d   :  { %47 = vst.msk [vmem:[#allocation3] sm:$0xff] %vm46_vm0, %v338_v0  ;;  %48 = vst.msk [vmem:[#allocation3 + $0x8] sm:$0xff] %vm46_vm0, %v338_v0  ;;  %53 = vadd.xlane.f32.xlu0 %v49_v1  ;;  %220 = vmatprep.subr.mxu0 %v79_v2  ;;  %v78_v3 = vld [vmem:[#allocation7 + $0x70] sm:$0xff]  ;;  %v50_v4 = vld [vmem:[#allocation4 + $0x8] sm:$0xff]  ;;  %v339_v14 = vmov 0   ;;  %s340_s0 = smov [#allocation9]  }
  0x1e   :  { %221 = vmatpush3.msra.mxu0 %v79_v2  ;;  %v77_v5 = vld [vmem:[#allocation7 + $0x68] sm:$0xff]  ;;  %252 = vmatprep.mubr.f32.mxu0 %v49_v1  ;;  %v76_v6 = vld [vmem:[#allocation7 + $0x60] sm:$0xff]  ;;  %v75_v7 = vld [vmem:[#allocation7 + $0x58] sm:$0xff]  ;;  %s189_s1 = sshll.u32 %s340_s0, 4  ;;  %s190_s1 = int_to_ptr.vmem [resolvable:$true] %s189_s1 }
  0x1f   :  { %222 = vmatprep.subr.mxu0 %v78_v3  ;;  %v74_v8 = vld [vmem:[#allocation7 + $0x50] sm:$0xff]  ;;  %v73_v9 = vld [vmem:[#allocation7 + $0x48] sm:$0xff]  ;;  %v72_v10 = vld [vmem:[#allocation7 + $0x40] sm:$0xff]  ;;  %262 = vset.pattern.permute.xlu1 %v339_v14  ;;  %s308_s21 = scalar_lea.vmem %s190_s1, 256  ;;  %p313_p11 = scmp.lt.s32.totalorder %s190_s1, %s190_s1 }
  0x20   :  { %223 = vmatpush3.msra.mxu0 %v78_v3  ;;  %v71_v11 = vld [vmem:[#allocation7 + $0x38] sm:$0xff]  ;;  %v70_v12 = vld [vmem:[#allocation7 + $0x30] sm:$0xff]  ;;  %v69_v13 = vld [vmem:[#allocation7 + $0x28] sm:$0xff]  ;;  %263 = vset.pattern.permute.xlu0 %v339_v14  ;;  %p309_p10 = scmp.ne.s32.totalorder %s190_s1, %s308_s21  ;;  %p314_p12 = scmp.lt.s32.totalorder %s308_s21, %s308_s21 }
  0x21   :  { %55 = vadd.xlane.f32.xlu0 %v50_v4  ;;  %224 = vmatprep.subr.mxu0 %v77_v5  ;;  %v68_v15 = vld [vmem:[#allocation7 + $0x20] sm:$0xff]  ;;  %v67_v16 = vld [vmem:[#allocation7 + $0x18] sm:$0xff]  ;;  %v66_v17 = vld [vmem:[#allocation7 + $0x10] sm:$0xff] }
  0x22   :  { %225 = vmatpush3.msra.mxu0 %v77_v5  ;;  %v65_v18 = vld [vmem:[#allocation7 + $0x8] sm:$0xff]  ;;  %v64_v19 = vld [vmem:[#allocation7] sm:$0xff]  ;;  %p315_p13 = por %p314_p12, %p313_p11 }
  0x23   :  { %226 = vmatprep.subr.mxu0 %v76_v6 }
  0x24   :  { %227 = vmatpush3.msra.mxu0 %v76_v6  ;;  %v51_v20 = vld [vmem:[#allocation3] sm:$0xff]  ;;  %v52_v23 = vld [vmem:[#allocation3 + $0x8] sm:$0xff]  ;;  %p316_p0 = pnand %p315_p13, %p309_p10 }
  0x25   :  { %228 = vmatprep.subr.mxu0 %v75_v7 }
  0x26   :  { %229 = vmatpush3.msra.mxu0 %v75_v7 }
  0x27   :  { %230 = vmatprep.subr.mxu0 %v74_v8 }
  0x28   :  { %231 = vmatpush3.msra.mxu0 %v74_v8 }
  0x29   :  { %232 = vmatprep.subr.mxu0 %v73_v9 }
  0x2a   :  { %233 = vmatpush3.msra.mxu0 %v73_v9 }
  0x2b   :  { %234 = vmatprep.subr.mxu0 %v72_v10 }
  0x2c   :  { %235 = vmatpush3.msra.mxu0 %v72_v10 }
  0x2d   :  { %236 = vmatprep.subr.mxu0 %v71_v11 }
  0x2e   :  { %237 = vmatpush3.msra.mxu0 %v71_v11 }
  0x2f   :  { %238 = vmatprep.subr.mxu0 %v70_v12 }
  0x30   :  { %239 = vmatpush3.msra.mxu0 %v70_v12 }
  0x31   :  { %240 = vmatprep.subr.mxu0 %v69_v13 }
  0x32   :  { %241 = vmatpush3.msra.mxu0 %v69_v13 }
  0x33   :  { %242 = vmatprep.subr.mxu0 %v68_v15 }
  0x34   :  { %243 = vmatpush3.msra.mxu0 %v68_v15 }
  0x35   :  { %244 = vmatprep.subr.mxu0 %v67_v16 }
  0x36   :  { %245 = vmatpush3.msra.mxu0 %v67_v16 }
  0x37   :  { %246 = vmatprep.subr.mxu0 %v66_v17 }
  0x38   :  { %247 = vmatpush3.msra.mxu0 %v66_v17 }
  0x39   :  { %248 = vmatprep.subr.mxu0 %v65_v18 }
  0x3a   :  { %249 = vmatpush3.msra.mxu0 %v65_v18 }
  0x3b   :  { %250 = vmatprep.subr.mxu0 %v64_v19 }
  0x3c   :  { %251 = vmatpush3.msra.mxu0 %v64_v19 }
  0x3d   :  { %253 = vmatmul.mubr.f32.vlgmr.msra.gmra.mxu0 %v50_v4 }
  0xa6   :  { %v54_v21 = vpop.xlane.xlu0 %53 }
  0xa7   :  { %v57_v22 = vadd.f32 %v54_v21, %v51_v20 }
  0xa9   :  { %60 = vst.msk [vmem:[#allocation3] sm:$0xff] %vm46_vm0, %v57_v22 }
  0xaa   :  { %v56_v24 = vpop.xlane.xlu0 %55 }
  0xab   :  { %v58_v25 = vadd.f32 %v56_v24, %v52_v23 }
  0xad   :  { %61 = vst.msk [vmem:[#allocation3 + $0x8] sm:$0xff] %vm46_vm0, %v58_v25 }
  0xb0   :  { %v162_v26 = vld [vmem:[#allocation3] sm:$0xff] }
  0xb1   :  { %v164_v27 = vmax.f32 %v162_v26, 1.0 }
  0xb3   :  { %264 = vrcp.f32 %v164_v27 }
  0xb4   :  { %v163_v28 = vld [vmem:[#allocation3 + $0x8] sm:$0xff] }
  0xb5   :  { %v165_v29 = vmax.f32 %v163_v28, 1.0 }
  0xb7   :  { %266 = vrcp.f32 %v165_v29 }
  0xc0   :  { %v265_v30 = vpop.eup %264 }
  0xc1   :  { %172 = vperm.xlu1 %262, %v265_v30  }
  0xc4   :  { %v267_v31 = vpop.eup %266 }
  0xc5   :  { %177 = vperm.xlu1 %262, %v267_v31  }
  0xfd   :  { %v254_v32 = vpop.f32.mrf.mxu0 }
  0xff   :  { %v146_v33 = vpop.f32.mrf.mxu0 }
 0x13c   :  { %v173_v34 = vpop.permute.xlu1 %172 }
 0x13d   :  { %v180_v35 = vmul.f32 %v173_v34, %v146_v33 }
 0x13f   :  { %182 = vst [vmem:[#allocation9] sm:$0xff] %v180_v35 }
 0x140   :  { %v178_v36 = vpop.permute.xlu1 %177 }
 0x141   :  { %v181_v37 = vmul.f32 %v254_v32, %v178_v36 }
 0x143   :  { %183 = vst [vmem:[#allocation9 + $0x8] sm:$0xff] %v181_v37 }
 0x144   :  { %319 = shalt.err (!%p316_p0)
}
 0x145   :  { %195 = dma.vmem_to_hbm [thread:$0]  %s190_s1, 256, %s380_s2, [#allocation6], %s335_s12, %s335_s12, %s336_s13  }
 0x146   :  { %332 = dma.done.wait [#allocation6], 256  }
 0x147   :  { %333 = vsyncadd [#allocation6], 4294967040 }
 0x148   :  { %199 = vsyncpa [#allocation5], 1 }
 0x149   :  { %200 = vsyncpa [#allocation8], 1 }
 0x14a   :  { %201 = vsyncpa [#allocation6], 1 }

</bundles_post_ra>
